<compile_context>
chip_gen: v5e
topology: v5e:2x2
jax: 0.10.0
libtpu: 0.0.40
codegen_flags: <defaults>
</compile_context>

<pallas_src>
import functools
import math

import jax
import jax.numpy as jnp
from jax import lax
from jax.experimental import pallas as pl
from jax.experimental.pallas import tpu as pltpu

_LANES = 128


@functools.lru_cache(maxsize=1)
def _vmem_capacity_bytes():
    """Best-effort per-core VMEM capacity; conservative fallback (v7x)."""
    try:
        info = pltpu.get_tpu_info()
        cap = getattr(info, "vmem_capacity_bytes", None)
        if cap:
            return int(cap)
    except Exception:
        pass
    return 64 * 1024 * 1024


def _dice_partial_kernel(x_ref, t_ref, w_ref, out_ref, *, nslab, rem):
    """Accumulate lane-wide partial sums for one (batch, pixel super-tile) block.

    x_ref: (C,  S, T) VMEM tile (input)
    t_ref: (Ct, S, T) VMEM tile (target),  Ct in {1, C}
    w_ref: (Cw, S, T) VMEM tile (weight),  Cw in {1, C}
    out_ref: (3, C, S, 128) resident f32 accumulator:
        [0] sum(x*t*w), [1] sum(x*x*w), [2] sum(t*t*w)
    T = nslab * 128 + rem (rem > 0 only in the single-full-tile configuration).
    """
    k = pl.program_id(2)

    @pl.when(k == 0)
    def _():
        out_ref[...] = jnp.zeros_like(out_ref)

    c, s = x_ref.shape[0], x_ref.shape[1]
    ctg = max(t_ref.shape[0], w_ref.shape[0])   # channels of the t*t*w product

    if nslab > 0:
        def body(j, carry):
            a_num, a_in, a_tg = carry
            lo = pl.multiple_of(j * _LANES, _LANES)
            sl = pl.ds(lo, _LANES)
            x = x_ref[:, :, sl].astype(jnp.float32)
            t = t_ref[:, :, sl].astype(jnp.float32)
            w = w_ref[:, :, sl].astype(jnp.float32)
            xw = x * w
            tw = t * w
            return (a_num + xw * t, a_in + xw * x, a_tg + tw * t)

        init = (jnp.zeros((c, s, _LANES), jnp.float32),
                jnp.zeros((c, s, _LANES), jnp.float32),
                jnp.zeros((ctg, s, _LANES), jnp.float32))
        a_num, a_in, a_tg = lax.fori_loop(0, nslab, body, init,
                                          unroll=min(nslab, 8))
        if ctg != c:
            a_tg = jnp.broadcast_to(a_tg, (c, s, _LANES))
        out_ref[0] += a_num
        out_ref[1] += a_in
        out_ref[2] += a_tg

    if rem > 0:
        # Only the single-full-tile configuration has a non-128-multiple width;
        # this narrow (masked) accumulate runs once per tile, never in the hot
        # multi-tile streaming path.
        lo = nslab * _LANES
        x = x_ref[:, :, lo:].astype(jnp.float32)
        t = t_ref[:, :, lo:].astype(jnp.float32)
        w = w_ref[:, :, lo:].astype(jnp.float32)
        xw = x * w
        tw = t * w
        p_tg = tw * t
        if p_tg.shape[0] != c:
            p_tg = jnp.broadcast_to(p_tg, (c, s, rem))
        out_ref[0, :, :, :rem] += xw * t
        out_ref[1, :, :, :rem] += xw * x
        out_ref[2, :, :, :rem] += p_tg


def _dice_partial_sums(x4, t4, w4, *, tile, steps, p_split, nslab, rem,
                       vmem_limit):
    """x4: (N, C, S, HWV), t4/w4: (N, {1|C}, S, HWV) -> (N*p_split, 3, C, S, 128)."""
    n_b, c, s, _ = x4.shape
    ct, cw = t4.shape[1], w4.shape[1]

    kernel = functools.partial(_dice_partial_kernel, nslab=nslab, rem=rem)

    def in_map(n, p, k):
        return (n, 0, 0, p * steps + k)

    in_specs = [
        pl.BlockSpec((None, c, s, tile), in_map),
        pl.BlockSpec((None, ct, s, tile), in_map),
        pl.BlockSpec((None, cw, s, tile), in_map),
    ]
    out_spec = pl.BlockSpec((None, 3, c, s, _LANES),
                            lambda n, p, k: (n * p_split + p, 0, 0, 0, 0))

    return pl.pallas_call(
        kernel,
        out_shape=jax.ShapeDtypeStruct((n_b * p_split, 3, c, s, _LANES),
                                       jnp.float32),
        grid_spec=pltpu.PrefetchScalarGridSpec(
            num_scalar_prefetch=0,
            grid=(n_b, p_split, steps),
            in_specs=in_specs,
            out_specs=out_spec,
        ),
        compiler_params=pltpu.CompilerParams(
            dimension_semantics=("parallel", "parallel", "arbitrary"),
            vmem_limit_bytes=vmem_limit,
        ),
    )(x4, t4, w4)


@functools.partial(jax.jit, static_argnames=("channelwise", "eps", "block_bytes"))
def sorensen_dice_loss_pixel_weights(inp, target, weight, channelwise=True,
                                     eps=1e-6, block_bytes=None):
    """Forward pass equivalent to SorensenDiceLossPixelWeights.forward."""
    N, C = inp.shape[0], inp.shape[1]
    spatial = inp.shape[2:]
    HW = int(math.prod(spatial)) if spatial else 1

    def normalize(arr):
        """Return an (N, c, HW) view with c in {1, C} without materializing a
        channel broadcast; anything else falls back to a full broadcast."""
        if arr.shape == inp.shape:
            return arr.reshape(N, C, HW)
        if (arr.ndim == inp.ndim and arr.shape[0] == N and arr.shape[1] == 1
                and arr.shape[2:] == spatial and C > 1):
            return arr.reshape(N, 1, HW)
        return jnp.broadcast_to(arr, inp.shape).reshape(N, C, HW)

    x3 = inp.reshape(N, C, HW)
    t3 = normalize(target)
    w3 = normalize(weight)
    Ct, Cw = t3.shape[1], w3.shape[1]

    # Sublane fill: view the pixel axis as (S, HW // S) with S | HW, S <= 8, so
    # kernel tiles (.., S, T) keep vreg sublanes full even for small C.
    S = next(s for s in (8, 4, 2, 1) if HW % s == 0)
    HWV = HW // S
    x4 = x3.reshape(N, C, S, HWV)
    t4 = t3.reshape(N, Ct, S, HWV)
    w4 = w3.reshape(N, Cw, S, HWV)

    # Tile sizing from a per-input VMEM byte budget, TPU-generation aware.
    itemsize = max(jnp.dtype(a.dtype).itemsize for a in (x4, t4, w4))
    vmem_cap = _vmem_capacity_bytes()
    if block_bytes is None:
        block_bytes = min(8 * 1024 * 1024, max(1 * 1024 * 1024, vmem_cap // 16))
    cap = max(_LANES, (block_bytes // (itemsize * C * S)) // _LANES * _LANES)

    if HWV <= cap:
        tile, grid_hw = HWV, 1
    else:
        tile, grid_hw = cap, HWV // cap
    # Second parallel grid axis: use both v7x TensorCores when N == 1.
    p_split = 2 if (N == 1 and grid_hw >= 2) else 1
    steps = grid_hw // p_split
    used = steps * p_split * tile
    nslab, rem = tile // _LANES, tile % _LANES

    in_live = 2 * itemsize * S * tile * (C + Ct + Cw)      # double-buffered inputs
    out_live = 2 * 4 * 3 * C * S * _LANES                  # resident accumulator
    vmem_limit = int(min(max(32 * 1024 * 1024,
                             in_live + out_live + 8 * 1024 * 1024),
                         (vmem_cap * 9) // 10))

    sums = _dice_partial_sums(x4, t4, w4, tile=tile, steps=steps,
                              p_split=p_split, nslab=nslab, rem=rem,
                              vmem_limit=vmem_limit)        # (N*P, 3, C, S, 128)
    per = jnp.sum(sums, axis=(0, 3, 4))                     # (3, C)
    num, d_in, d_tg = per[0], per[1], per[2]

    # Ragged tail (< one tile per row, plus any super-tile remainder): plain JAX.
    tail = HWV - used
    if tail > 0:
        xt = x4[..., used:].astype(jnp.float32)
        tt = t4[..., used:].astype(jnp.float32)
        wt = w4[..., used:].astype(jnp.float32)
        xtw = xt * wt
        ttw = tt * wt
        num = num + jnp.sum(xtw * tt, axis=(0, 2, 3))
        d_in = d_in + jnp.sum(xtw * xt, axis=(0, 2, 3))
        d_tg = d_tg + jnp.broadcast_to(jnp.sum(ttw * tt, axis=(0, 2, 3)), (C,))

    if channelwise:
        den = d_in + d_tg
        return jnp.sum(-2.0 * (num / jnp.maximum(den, eps)))

    # Global (non-channelwise) variant: if target AND weight are both channel-
    # broadcast, (t*t*w).sum() must NOT be counted once per channel.
    tg_full = (Ct == C) or (Cw == C) or (C == 1)
    num_g = jnp.sum(num)
    din_g = jnp.sum(d_in)
    dtg_g = jnp.sum(d_tg) if tg_full else d_tg[0]
    return -2.0 * (num_g / jnp.maximum(din_g + dtg_g, eps))


def _flatten_samples(x):
    x = jnp.moveaxis(x, 1, 0)
    return x.reshape(x.shape[0], -1)


def _reference(inp, target, weight, channelwise=True, eps=1e-6):
    """Pure-JAX reference mirroring the PyTorch module exactly."""
    inp = inp.astype(jnp.float32)
    target = target.astype(jnp.float32)
    weight = weight.astype(jnp.float32)
    if not channelwise:
        num = jnp.sum(inp * target * weight)
        den = jnp.sum(inp * inp * weight) + jnp.sum(target * target * weight)
        return -2.0 * (num / jnp.maximum(den, eps))
    fi, ft, fw = map(_flatten_samples, (inp, target, weight))
    num = jnp.sum(fi * ft * fw, axis=-1)
    den = jnp.sum(fi * fi * fw, axis=-1) + jnp.sum(ft * ft * fw, axis=-1)
    return jnp.sum(-2.0 * (num / jnp.maximum(den, eps)))


if __name__ == "__main__":
    key = jax.random.PRNGKey(0)
    k1, k2, k3 = jax.random.split(key, 3)

    N, C, H, W = 2, 4, 16, 16
    x = jax.nn.sigmoid(jax.random.normal(k1, (N, C, H, W), jnp.float32))
    t = (jax.random.uniform(k2, (N, C, H, W)) > 0.5).astype(jnp.float32)
    w = jax.random.uniform(k3, (N, C, H, W), jnp.float32)

    # 1) channelwise, full shapes
    loss = jax.block_until_ready(
        sorensen_dice_loss_pixel_weights(x, t, w, channelwise=True))
    ref = _reference(x, t, w, channelwise=True)
    assert jnp.allclose(loss, ref, rtol=1e-5, atol=1e-5), (loss, ref)

    # 2) global (channelwise=False)
    loss_nc = jax.block_until_ready(
        sorensen_dice_loss_pixel_weights(x, t, w, channelwise=False))
    ref_nc = _reference(x, t, w, channelwise=False)
    assert jnp.allclose(loss_nc, ref_nc, rtol=1e-5, atol=1e-5), (loss_nc, ref_nc)

    # 3) (N,1,H,W) pixel weights: streamed un-broadcast, broadcast in-kernel.
    w1 = jax.random.uniform(k3, (N, 1, H, W), jnp.float32)
    loss_b = jax.block_until_ready(
        sorensen_dice_loss_pixel_weights(x, t, w1, channelwise=True))
    ref_b = _reference(x, t, w1, channelwise=True)
    assert jnp.allclose(loss_b, ref_b, rtol=1e-5, atol=1e-5), (loss_b, ref_b)

    # 4) Multi-tile streaming path + ragged tail + N==1 pixel-axis core split,
    #    forced via a tiny per-block byte budget.
    N2, H2, W2 = 1, 48, 48
    x2 = jax.nn.sigmoid(jax.random.normal(k1, (N2, C, H2, W2), jnp.float32))
    t2 = (jax.random.uniform(k2, (N2, C, H2, W2)) > 0.5).astype(jnp.float32)
    w2 = jax.random.uniform(k3, (N2, C, H2, W2), jnp.float32)
    loss2 = jax.block_until_ready(
        sorensen_dice_loss_pixel_weights(x2, t2, w2, channelwise=True,
                                         block_bytes=16384))
    ref2 = _reference(x2, t2, w2, channelwise=True)
    assert jnp.allclose(loss2, ref2, rtol=1e-5, atol=1e-5), (loss2, ref2)

    print("KERNEL_OK")
</pallas_src>

<mosaic_0001>
module attributes {stable_mosaic.version = 11 : i64} {
  func.func @_dice_partial_kernel(%arg0: i32, %arg1: i32, %arg2: i32, %arg3: memref<1x4x8x32xf32, #tpu.memory_space<vmem>>, %arg4: memref<1x4x8x32xf32, #tpu.memory_space<vmem>>, %arg5: memref<1x4x8x32xf32, #tpu.memory_space<vmem>>, %arg6: memref<1x3x4x8x128xf32, #tpu.memory_space<vmem>>) attributes {dimension_semantics = [#tpu.dimension_semantics<parallel>, #tpu.dimension_semantics<parallel>, #tpu.dimension_semantics<arbitrary>], iteration_bounds = array<i64: 2, 1, 1>, scalar_prefetch = 0 : i64, scratch_operands = 0 : i64, tpu.core_type = #tpu.core_type<tc>, window_params = [{transform_indices = @transform_0, window_bounds = array<i64: 1, 4, 8, 32>}, {transform_indices = @transform_1, window_bounds = array<i64: 1, 4, 8, 32>}, {transform_indices = @transform_2, window_bounds = array<i64: 1, 4, 8, 32>}, {transform_indices = @transform_3, window_bounds = array<i64: 1, 3, 4, 8, 128>}]} {
    %c0_i32 = arith.constant 0 : i32
    %0 = arith.cmpi eq, %arg2, %c0_i32 : i32
    %1 = arith.extui %0 : i1 to i32
    %c0_i32_0 = arith.constant 0 : i32
    %2 = arith.cmpi ne, %1, %c0_i32_0 : i32
    scf.if %2 {
      %cst = arith.constant 0.000000e+00 : f32
      %32 = vector.broadcast %cst : f32 to vector<3x4x8x128xf32>
      %c0_40 = arith.constant 0 : index
      %c0_41 = arith.constant 0 : index
      %c0_42 = arith.constant 0 : index
      %c0_43 = arith.constant 0 : index
      %c0_44 = arith.constant 0 : index
      %33 = vector.load %arg6[%c0_40, %c0_41, %c0_42, %c0_43, %c0_44] : memref<1x3x4x8x128xf32, #tpu.memory_space<vmem>>, vector<1x3x4x8x128xf32>
      %34 = vector.shape_cast %33 : vector<1x3x4x8x128xf32> to vector<3x4x8x128xf32>
      %35 = vector.shape_cast %32 : vector<3x4x8x128xf32> to vector<1x3x4x8x128xf32>
      tpu.vector_store %arg6[%c0_40, %c0_41, %c0_42, %c0_43, %c0_44], %35 {strides = array<i32>} : memref<1x3x4x8x128xf32, #tpu.memory_space<vmem>>, vector<1x3x4x8x128xf32>,
    } else {
    }
    %c0 = arith.constant 0 : index
    %c0_1 = arith.constant 0 : index
    %c0_2 = arith.constant 0 : index
    %c0_3 = arith.constant 0 : index
    %3 = vector.load %arg3[%c0, %c0_1, %c0_2, %c0_3] : memref<1x4x8x32xf32, #tpu.memory_space<vmem>>, vector<1x4x8x32xf32>
    %4 = vector.shape_cast %3 : vector<1x4x8x32xf32> to vector<4x8x32xf32>
    %c0_4 = arith.constant 0 : index
    %c0_5 = arith.constant 0 : index
    %c0_6 = arith.constant 0 : index
    %c0_7 = arith.constant 0 : index
    %5 = vector.load %arg4[%c0_4, %c0_5, %c0_6, %c0_7] : memref<1x4x8x32xf32, #tpu.memory_space<vmem>>, vector<1x4x8x32xf32>
    %6 = vector.shape_cast %5 : vector<1x4x8x32xf32> to vector<4x8x32xf32>
    %c0_8 = arith.constant 0 : index
    %c0_9 = arith.constant 0 : index
    %c0_10 = arith.constant 0 : index
    %c0_11 = arith.constant 0 : index
    %7 = vector.load %arg5[%c0_8, %c0_9, %c0_10, %c0_11] : memref<1x4x8x32xf32, #tpu.memory_space<vmem>>, vector<1x4x8x32xf32>
    %8 = vector.shape_cast %7 : vector<1x4x8x32xf32> to vector<4x8x32xf32>
    %9 = arith.mulf %4, %8 : vector<4x8x32xf32>
    %10 = arith.mulf %6, %8 : vector<4x8x32xf32>
    %11 = arith.mulf %10, %6 : vector<4x8x32xf32>
    %c0_12 = arith.constant 0 : index
    %c0_13 = arith.constant 0 : index
    %c0_14 = arith.constant 0 : index
    %c0_15 = arith.constant 0 : index
    %c0_16 = arith.constant 0 : index
    %12 = vector.load %arg6[%c0_12, %c0_13, %c0_14, %c0_15, %c0_16] : memref<1x3x4x8x128xf32, #tpu.memory_space<vmem>>, vector<1x1x4x8x32xf32>
    %13 = vector.shape_cast %12 : vector<1x1x4x8x32xf32> to vector<4x8x32xf32>
    %14 = arith.mulf %9, %6 : vector<4x8x32xf32>
    %15 = arith.addf %13, %14 : vector<4x8x32xf32>
    %c0_17 = arith.constant 0 : index
    %c0_18 = arith.constant 0 : index
    %c0_19 = arith.constant 0 : index
    %c0_20 = arith.constant 0 : index
    %c0_21 = arith.constant 0 : index
    %16 = vector.load %arg6[%c0_17, %c0_18, %c0_19, %c0_20, %c0_21] : memref<1x3x4x8x128xf32, #tpu.memory_space<vmem>>, vector<1x1x4x8x32xf32>
    %17 = vector.shape_cast %16 : vector<1x1x4x8x32xf32> to vector<4x8x32xf32>
    %18 = vector.shape_cast %15 : vector<4x8x32xf32> to vector<1x1x4x8x32xf32>
    tpu.vector_store %arg6[%c0_17, %c0_18, %c0_19, %c0_20, %c0_21], %18 {strides = array<i32>} : memref<1x3x4x8x128xf32, #tpu.memory_space<vmem>>, vector<1x1x4x8x32xf32>,
    %c0_22 = arith.constant 0 : index
    %c1 = arith.constant 1 : index
    %c0_23 = arith.constant 0 : index
    %c0_24 = arith.constant 0 : index
    %c0_25 = arith.constant 0 : index
    %19 = vector.load %arg6[%c0_22, %c1, %c0_23, %c0_24, %c0_25] : memref<1x3x4x8x128xf32, #tpu.memory_space<vmem>>, vector<1x1x4x8x32xf32>
    %20 = vector.shape_cast %19 : vector<1x1x4x8x32xf32> to vector<4x8x32xf32>
    %21 = arith.mulf %9, %4 : vector<4x8x32xf32>
    %22 = arith.addf %20, %21 : vector<4x8x32xf32>
    %c0_26 = arith.constant 0 : index
    %c1_27 = arith.constant 1 : index
    %c0_28 = arith.constant 0 : index
    %c0_29 = arith.constant 0 : index
    %c0_30 = arith.constant 0 : index
    %23 = vector.load %arg6[%c0_26, %c1_27, %c0_28, %c0_29, %c0_30] : memref<1x3x4x8x128xf32, #tpu.memory_space<vmem>>, vector<1x1x4x8x32xf32>
    %24 = vector.shape_cast %23 : vector<1x1x4x8x32xf32> to vector<4x8x32xf32>
    %25 = vector.shape_cast %22 : vector<4x8x32xf32> to vector<1x1x4x8x32xf32>
    tpu.vector_store %arg6[%c0_26, %c1_27, %c0_28, %c0_29, %c0_30], %25 {strides = array<i32>} : memref<1x3x4x8x128xf32, #tpu.memory_space<vmem>>, vector<1x1x4x8x32xf32>,
    %c0_31 = arith.constant 0 : index
    %c2 = arith.constant 2 : index
    %c0_32 = arith.constant 0 : index
    %c0_33 = arith.constant 0 : index
    %c0_34 = arith.constant 0 : index
    %26 = vector.load %arg6[%c0_31, %c2, %c0_32, %c0_33, %c0_34] : memref<1x3x4x8x128xf32, #tpu.memory_space<vmem>>, vector<1x1x4x8x32xf32>
    %27 = vector.shape_cast %26 : vector<1x1x4x8x32xf32> to vector<4x8x32xf32>
    %28 = arith.addf %27, %11 : vector<4x8x32xf32>
    %c0_35 = arith.constant 0 : index
    %c2_36 = arith.constant 2 : index
    %c0_37 = arith.constant 0 : index
    %c0_38 = arith.constant 0 : index
    %c0_39 = arith.constant 0 : index
    %29 = vector.load %arg6[%c0_35, %c2_36, %c0_37, %c0_38, %c0_39] : memref<1x3x4x8x128xf32, #tpu.memory_space<vmem>>, vector<1x1x4x8x32xf32>
    %30 = vector.shape_cast %29 : vector<1x1x4x8x32xf32> to vector<4x8x32xf32>
    %31 = vector.shape_cast %28 : vector<4x8x32xf32> to vector<1x1x4x8x32xf32>
    tpu.vector_store %arg6[%c0_35, %c2_36, %c0_37, %c0_38, %c0_39], %31 {strides = array<i32>} : memref<1x3x4x8x128xf32, #tpu.memory_space<vmem>>, vector<1x1x4x8x32xf32>,
    return
  }
  func.func @transform_0(%arg0: i32, %arg1: i32, %arg2: i32) -> (i32, i32, i32, i32) {
    %c1_i32 = arith.constant 1 : i32
    %0 = arith.muli %arg1, %c1_i32 : i32
    %1 = arith.addi %0, %arg2 : i32
    %c0_i32 = arith.constant 0 : i32
    %c0_i32_0 = arith.constant 0 : i32
    %c0_i32_1 = arith.constant 0 : i32
    return %arg0, %c0_i32, %c0_i32_0, %1 : i32, i32, i32, i32
  }
  func.func @transform_1(%arg0: i32, %arg1: i32, %arg2: i32) -> (i32, i32, i32, i32) {
    %c1_i32 = arith.constant 1 : i32
    %0 = arith.muli %arg1, %c1_i32 : i32
    %1 = arith.addi %0, %arg2 : i32
    %c0_i32 = arith.constant 0 : i32
    %c0_i32_0 = arith.constant 0 : i32
    %c0_i32_1 = arith.constant 0 : i32
    return %arg0, %c0_i32, %c0_i32_0, %1 : i32, i32, i32, i32
  }
  func.func @transform_2(%arg0: i32, %arg1: i32, %arg2: i32) -> (i32, i32, i32, i32) {
    %c1_i32 = arith.constant 1 : i32
    %0 = arith.muli %arg1, %c1_i32 : i32
    %1 = arith.addi %0, %arg2 : i32
    %c0_i32 = arith.constant 0 : i32
    %c0_i32_0 = arith.constant 0 : i32
    %c0_i32_1 = arith.constant 0 : i32
    return %arg0, %c0_i32, %c0_i32_0, %1 : i32, i32, i32, i32
  }
  func.func @transform_3(%arg0: i32, %arg1: i32, %arg2: i32) -> (i32, i32, i32, i32, i32) {
    %c1_i32 = arith.constant 1 : i32
    %0 = arith.muli %arg0, %c1_i32 : i32
    %1 = arith.addi %0, %arg1 : i32
    %c0_i32 = arith.constant 0 : i32
    %c0_i32_0 = arith.constant 0 : i32
    %c0_i32_1 = arith.constant 0 : i32
    %c0_i32_2 = arith.constant 0 : i32
    %c0_i32_3 = arith.constant 0 : i32
    return %1, %c0_i32, %c0_i32_0, %c0_i32_1, %c0_i32_2 : i32, i32, i32, i32, i32
  }
}

</mosaic_0001>

<bundles_post_ra>
// kernel: sorensen_dice_loss_pixel_weights.1
= control target key start
LH: loop header
LB: loop body
LE: loop exit
PB: predicated region body
PF: predicated region fallthrough
CT: control target
= control target key end

     0   :  { %s592_s12 = smov 0   ;;  %s594_s13 = smov 0   ;;  %s669_s0 = inlined_call_operand.vmem [shape: f32[2,4,8,32], index: 0, kind: input, shape index: {}]   ;;  %s670_s1 = inlined_call_operand.vmem [shape: f32[2,4,8,32], index: 1, kind: input, shape index: {}]   ;;  %s671_s2 = inlined_call_operand.vmem [shape: f32[2,4,8,32], index: 2, kind: input, shape index: {}]   ;;  %s672_s3 = inlined_call_operand.vmem [shape: f32[2,3,4,8,128], index: 3, kind: output, shape index: {}]  }
   0x1   :  { %s596_s14 = smov 0  }
   0x2 LB: > { %s32_s15 = sadd.s32 1, %s565_s13  ;;  %p492_p0 = scmp.ge.s32.totalorder %s569_s14, 1  ;;  %s569_s14 = sphi %s596_s14, %s13_s14   ;;  %s565_s13 = sphi %s594_s13, %s674_s13   ;;  %s561_s12 = sphi %s592_s12, %s673_s12  }
   0x3   : > { %p34_p1 = scmp.ge.s32.totalorder %s32_s15, 2  ;;  %p205_p2 = scmp.lt.s32.totalorder %s569_s14, 3 }
   0x5   : > { %s676_s15 = smov (%p34_p1, %s32_s15), 0  ;;  %p206_p3 = pnand %p492_p0, %p205_p2 }
   0x6   : > { %p253_p4 = scmp.lt.s32.totalorder (!%p206_p3), %s561_s12, 1 }
   0x7   : > { %209 = sbr.rel (%p206_p3) target bundleno = 40 (0x28), region = 32 }
   0xc   : > { %s678_s12 = smov (!%p253_p4, %s561_s12), 1  ;;  %v571_v2 = vmov 0.0   ;;  %vm341_vm0 = vcmask 261120  }
   0xd   : > { %s521_s16 = smul.u32 96, %s678_s12  ;;  %s518_s17 = sshll.u32 %s678_s12, 5 }
   0xe   : > { %s260_s20 = scalar_lea.vmem %s669_s0, %s518_s17  ;;  %s280_s26 = scalar_lea.vmem %s671_s2, %s518_s17 }
   0xf   : > { %s616_s23 = scalar_lea.vmem %s672_s3, %s521_s16  ;;  %v305_v0 = vld [vmem:[%s260_s20] sm:$0xff]  ;;  %v306_v1 = vld [vmem:[%s260_s20 + $0x8] sm:$0xff]  ;;  %s270_s29 = scalar_lea.vmem %s670_s1, %s518_s17  ;;  %v307_v7 = vld [vmem:[%s260_s20 + $0x10] sm:$0xff] }
  0x10   : > { %293 = vst [vmem:[%s616_s23] sm:$0xff] %v571_v2  ;;  %v313_v3 = vld [vmem:[%s280_s26] sm:$0xff]  ;;  %v314_v4 = vld [vmem:[%s280_s26 + $0x8] sm:$0xff]  ;;  %v315_v8 = vld [vmem:[%s280_s26 + $0x10] sm:$0xff] }
  0x11   : > { %294 = vst [vmem:[%s616_s23 + $0x8] sm:$0xff] %v571_v2  ;;  %v317_v5 = vmul.f32 %v313_v3, %v305_v0  ;;  %v318_v6 = vmul.f32 %v314_v4, %v306_v1  ;;  %v319_v9 = vmul.f32 %v315_v8, %v307_v7  ;;  %v308_v10 = vld [vmem:[%s260_s20 + $0x18] sm:$0xff]  ;;  %v309_v12 = vld [vmem:[%s270_s29] sm:$0xff]  ;;  %v310_v15 = vld [vmem:[%s270_s29 + $0x8] sm:$0xff] }
  0x12   : > { %295 = vst [vmem:[%s616_s23 + $0x10] sm:$0xff] %v571_v2  ;;  %v316_v11 = vld [vmem:[%s280_s26 + $0x18] sm:$0xff]  ;;  %v311_v17 = vld [vmem:[%s270_s29 + $0x10] sm:$0xff]  ;;  %v321_v22 = vmul.f32 %v313_v3, %v309_v12  ;;  %v322_v24 = vmul.f32 %v314_v4, %v310_v15 }
  0x13   : > { %296 = vst [vmem:[%s616_s23 + $0x18] sm:$0xff] %v571_v2  ;;  %v320_v13 = vmul.f32 %v316_v11, %v308_v10  ;;  %v333_v14 = vmul.f32 %v317_v5, %v309_v12  ;;  %v334_v16 = vmul.f32 %v318_v6, %v310_v15  ;;  %v335_v18 = vmul.f32 %v319_v9, %v311_v17  ;;  %v312_v19 = vld [vmem:[%s270_s29 + $0x18] sm:$0xff] }
  0x14   : > { %297 = vst [vmem:[%s616_s23 + $0x20] sm:$0xff] %v571_v2  ;;  %v351_v21 = vmul.f32 %v317_v5, %v305_v0  ;;  %v352_v23 = vmul.f32 %v318_v6, %v306_v1  ;;  %v353_v25 = vmul.f32 %v319_v9, %v307_v7  ;;  %v323_v26 = vmul.f32 %v315_v8, %v311_v17 }
  0x15   : > { %298 = vst [vmem:[%s616_s23 + $0x28] sm:$0xff] %v571_v2  ;;  %v336_v20 = vmul.f32 %v320_v13, %v312_v19  ;;  %v354_v27 = vmul.f32 %v320_v13, %v308_v10  ;;  %v324_v28 = vmul.f32 %v316_v11, %v312_v19  ;;  %v325_v29 = vmul.f32 %v321_v22, %v309_v12 }
  0x16   : > { %299 = vst [vmem:[%s616_s23 + $0x30] sm:$0xff] %v571_v2  ;;  %v326_v30 = vmul.f32 %v322_v24, %v310_v15  ;;  %v327_v31 = vmul.f32 %v323_v26, %v311_v17 }
  0x17   : > { %300 = vst [vmem:[%s616_s23 + $0x38] sm:$0xff] %v571_v2  ;;  %v328_v32 = vmul.f32 %v324_v28, %v312_v19 }
  0x18   : > { %301 = vst [vmem:[%s616_s23 + $0x40] sm:$0xff] %v571_v2 }
  0x19   : > { %302 = vst [vmem:[%s616_s23 + $0x48] sm:$0xff] %v571_v2 }
  0x1a   : > { %303 = vst [vmem:[%s616_s23 + $0x50] sm:$0xff] %v571_v2 }
  0x1b   : > { %304 = vst [vmem:[%s616_s23 + $0x58] sm:$0xff] %v571_v2 }
  0x1c   : > { %342 = vst.msk [vmem:[%s616_s23] sm:$0xff] %vm341_vm0, %v333_v14 }
  0x1d   : > { %343 = vst.msk [vmem:[%s616_s23 + $0x8] sm:$0xff] %vm341_vm0, %v334_v16 }
  0x1e   : > { %344 = vst.msk [vmem:[%s616_s23 + $0x10] sm:$0xff] %vm341_vm0, %v335_v18 }
  0x1f   : > { %345 = vst.msk [vmem:[%s616_s23 + $0x18] sm:$0xff] %vm341_vm0, %v336_v20 }
  0x20   : > { %504 = vst.msk [vmem:[%s616_s23 + $0x20] sm:$0xff] %vm341_vm0, %v351_v21 }
  0x21   : > { %505 = vst.msk [vmem:[%s616_s23 + $0x28] sm:$0xff] %vm341_vm0, %v352_v23 }
  0x22   : > { %506 = vst.msk [vmem:[%s616_s23 + $0x30] sm:$0xff] %vm341_vm0, %v353_v25 }
  0x23   : > { %507 = vst.msk [vmem:[%s616_s23 + $0x38] sm:$0xff] %vm341_vm0, %v354_v27 }
  0x24   : > { %512 = vst.msk [vmem:[%s616_s23 + $0x40] sm:$0xff] %vm341_vm0, %v325_v29 }
  0x25   : > { %513 = vst.msk [vmem:[%s616_s23 + $0x48] sm:$0xff] %vm341_vm0, %v326_v30 }
  0x26   : > { %514 = vst.msk [vmem:[%s616_s23 + $0x50] sm:$0xff] %vm341_vm0, %v327_v31 }
  0x27   : > { %515 = vst.msk [vmem:[%s616_s23 + $0x58] sm:$0xff] %vm341_vm0, %v328_v32 }
  0x28 PF: > { %s13_s14 = sadd.s32 1, %s569_s14   ;;  %s673_s12 = smov %s565_s13 }
  0x29   : > { %p10_p5 = scmp.ge.s32.totalorder %s13_s14, 4   ;;  %s674_s13 = smov %s676_s15 }
  0x2b   :  { %12 = sbr.rel (!%p10_p5) target bundleno = 2 (0x2), region = 74 }

</bundles_post_ra>
